<compile_context>
chip_gen: v6e
topology: v6e:2x2x1
jax: 0.10.0
libtpu: 0.0.40
codegen_flags: <defaults>
</compile_context>

<pallas_src>
import functools

import jax
import jax.numpy as jnp
import numpy as np
from jax import lax
from jax.experimental import pallas as pl
from jax.experimental.pallas import tpu as pltpu


# ----------------------------------------------------------------------------
# Kernel: one (batch, head, time1-tile) block.  out = x * clamp(mask, 0, 1)
# with mask[t, j] = ((j - (W-1)) + span[t] * max_span) / span_ramp + 1.
# (j - (W-1)) is exactly the last W entries of linspace(1-max_span, 0, max_span).
# ----------------------------------------------------------------------------
def _span_mask_kernel(span_ref, x_ref, out_ref, *, window, max_span, inv_ramp):
    x = x_ref[0, 0]                                   # (t1_tile, W) f32
    span = span_ref[0, 0]                             # (t1_tile, 1) f32

    col = lax.broadcasted_iota(jnp.int32, x.shape, 1).astype(jnp.float32)
    template = col - float(window - 1)                # (t1_tile, W)

    m = (template + span * float(max_span)) * inv_ramp + 1.0
    m = jnp.clip(m, 0.0, 1.0)
    out_ref[0, 0] = x * m


# ----------------------------------------------------------------------------
# Wrapper
# ----------------------------------------------------------------------------
def dynamic_span_mask(x, span_size, *, max_span, span_ramp):
    """x: (B, H, T1, W) f32 scores, W <= max_span; span_size: (B, H, T1) f32."""
    B, H, T1, W = x.shape
    assert W <= max_span, "window must not exceed max_span"
    assert span_size.shape == (B, H, T1)

    # Tile time1 only when it stays (8,128)-aligned; otherwise take the full
    # axis (block dim == array dim is always legal).
    t1_tile = T1
    for cand in (512, 256, 128):
        if T1 % cand == 0:
            t1_tile = cand
            break

    # span as (B, H, T1, 1) so the in-kernel view is already (t1_tile, 1) and
    # the broadcast over W is a cheap lane-broadcast.
    span4 = span_size.astype(jnp.float32).reshape(B, H, T1, 1)

    kernel = functools.partial(
        _span_mask_kernel,
        window=W, max_span=max_span, inv_ramp=1.0 / float(span_ramp))

    grid = (B, H, T1 // t1_tile)

    # Per-step VMEM: x tile + out tile + span column, double-buffered; give 4x
    # headroom, floor 4 MiB, cap 32 MiB (safe for v5e/v6e/v7x scoped limits).
    block_bytes = 4 * t1_tile * (2 * W + 1)
    vmem_limit = int(min(max(8 * block_bytes, 4 << 20), 32 << 20))

    return pl.pallas_call(
        kernel,
        out_shape=jax.ShapeDtypeStruct((B, H, T1, W), jnp.float32),
        grid_spec=pltpu.PrefetchScalarGridSpec(
            num_scalar_prefetch=0,
            grid=grid,
            in_specs=[
                pl.BlockSpec((1, 1, t1_tile, 1), lambda b, h, t: (b, h, t, 0)),
                pl.BlockSpec((1, 1, t1_tile, W), lambda b, h, t: (b, h, t, 0)),
            ],
            out_specs=pl.BlockSpec((1, 1, t1_tile, W),
                                   lambda b, h, t: (b, h, t, 0)),
        ),
        compiler_params=pltpu.CompilerParams(
            dimension_semantics=("parallel", "parallel", "parallel"),
            vmem_limit_bytes=vmem_limit),
    )(span4, x.astype(jnp.float32))


# ----------------------------------------------------------------------------
# Pure-JAX reference mirroring the PyTorch forward.
# Note: for W < max_span the torch code slices `mask[:, :, -W:]`; with a
# (B, H, T1) span this only makes sense on the *last* (window) axis, which is
# what we implement here (and in the kernel).  For W == max_span the branch is
# never taken and the two readings agree exactly.
# ----------------------------------------------------------------------------
def reference(x, span_size, *, max_span, span_ramp):
    template = jnp.linspace(1.0 - max_span, 0.0, max_span, dtype=jnp.float32)
    mask = template + span_size[..., None] * float(max_span)     # (B,H,T1,max_span)
    mask = mask / float(span_ramp) + 1.0
    mask = jnp.clip(mask, 0.0, 1.0)
    W = x.shape[-1]
    if W < max_span:
        mask = mask[..., -W:]
    return x * mask


if __name__ == "__main__":
    B, H, T1 = 2, 4, 8
    MAX_SPAN, SPAN_RAMP = 8, 2

    key0 = jax.random.PRNGKey(0)
    k_x1, k_x2, k_s = jax.random.split(key0, 3)

    # Dynamic spans in (0, 1) — what sigmoid(dynamic_linear(query)) produces.
    span_size = jax.nn.sigmoid(jax.random.normal(k_s, (B, H, T1), jnp.float32))

    # Case 1: window == max_span (the branch-free PyTorch path).
    x1 = jax.random.normal(k_x1, (B, H, T1, MAX_SPAN), jnp.float32)
    out1 = jax.block_until_ready(
        dynamic_span_mask(x1, span_size, max_span=MAX_SPAN, span_ramp=SPAN_RAMP))
    ref1 = reference(x1, span_size, max_span=MAX_SPAN, span_ramp=SPAN_RAMP)
    np.testing.assert_allclose(np.asarray(out1), np.asarray(ref1),
                               rtol=1e-5, atol=1e-6)

    # Case 2: window < max_span (mask restricted to the trailing window).
    W2 = 6
    x2 = jax.random.normal(k_x2, (B, H, T1, W2), jnp.float32)
    out2 = jax.block_until_ready(
        dynamic_span_mask(x2, span_size, max_span=MAX_SPAN, span_ramp=SPAN_RAMP))
    ref2 = reference(x2, span_size, max_span=MAX_SPAN, span_ramp=SPAN_RAMP)
    np.testing.assert_allclose(np.asarray(out2), np.asarray(ref2),
                               rtol=1e-5, atol=1e-6)

    # TODO(synk): get_dynamic_span / get_current_max_size use host-side .item()
    # syncs and are not part of forward(); they are not implemented as kernels.
    print("KERNEL_OK")
</pallas_src>

<mosaic_0001>
module attributes {stable_mosaic.version = 11 : i64} {
  func.func @_span_mask_kernel(%arg0: i32, %arg1: i32, %arg2: i32, %arg3: memref<1x1x8x1xf32, #tpu.memory_space<vmem>>, %arg4: memref<1x1x8x8xf32, #tpu.memory_space<vmem>>, %arg5: memref<1x1x8x8xf32, #tpu.memory_space<vmem>>) attributes {dimension_semantics = [#tpu.dimension_semantics<parallel>, #tpu.dimension_semantics<parallel>, #tpu.dimension_semantics<parallel>], iteration_bounds = array<i64: 2, 4, 1>, scalar_prefetch = 0 : i64, scratch_operands = 0 : i64, tpu.core_type = #tpu.core_type<tc>, window_params = [{transform_indices = @transform_0, window_bounds = array<i64: 1, 1, 8, 1>}, {transform_indices = @transform_1, window_bounds = array<i64: 1, 1, 8, 8>}, {transform_indices = @transform_2, window_bounds = array<i64: 1, 1, 8, 8>}]} {
    %c0 = arith.constant 0 : index
    %c0_0 = arith.constant 0 : index
    %c0_1 = arith.constant 0 : index
    %c0_2 = arith.constant 0 : index
    %0 = vector.load %arg4[%c0, %c0_0, %c0_1, %c0_2] : memref<1x1x8x8xf32, #tpu.memory_space<vmem>>, vector<1x1x8x8xf32>
    %1 = vector.shape_cast %0 : vector<1x1x8x8xf32> to vector<8x8xf32>
    %c0_3 = arith.constant 0 : index
    %c0_4 = arith.constant 0 : index
    %c0_5 = arith.constant 0 : index
    %c0_6 = arith.constant 0 : index
    %2 = vector.load %arg3[%c0_3, %c0_4, %c0_5, %c0_6] : memref<1x1x8x1xf32, #tpu.memory_space<vmem>>, vector<1x1x8x1xf32>
    %3 = vector.shape_cast %2 : vector<1x1x8x1xf32> to vector<8x1xf32>
    %4 = tpu.iota {dimensions = array<i32: 1>} : vector<8x8xi32>
    %5 = arith.sitofp %4 : vector<8x8xi32> to vector<8x8xf32>
    %cst = arith.constant 7.000000e+00 : f32
    %6 = vector.broadcast %cst : f32 to vector<8x8xf32>
    %7 = arith.subf %5, %6 : vector<8x8xf32>
    %cst_7 = arith.constant 8.000000e+00 : f32
    %8 = vector.broadcast %cst_7 : f32 to vector<8x1xf32>
    %9 = arith.mulf %3, %8 : vector<8x1xf32>
    %10 = vector.broadcast %9 : vector<8x1xf32> to vector<8x8xf32>
    %11 = arith.addf %7, %10 : vector<8x8xf32>
    %cst_8 = arith.constant 5.000000e-01 : f32
    %12 = vector.broadcast %cst_8 : f32 to vector<8x8xf32>
    %13 = arith.mulf %11, %12 : vector<8x8xf32>
    %cst_9 = arith.constant 1.000000e+00 : f32
    %14 = vector.broadcast %cst_9 : f32 to vector<8x8xf32>
    %15 = arith.addf %13, %14 : vector<8x8xf32>
    %cst_10 = arith.constant 0.000000e+00 : f32
    %cst_11 = arith.constant 1.000000e+00 : f32
    %16 = vector.broadcast %cst_10 : f32 to vector<8x8xf32>
    %17 = arith.maximumf %16, %15 : vector<8x8xf32>
    %18 = vector.broadcast %cst_11 : f32 to vector<8x8xf32>
    %19 = arith.minimumf %18, %17 : vector<8x8xf32>
    %20 = arith.mulf %1, %19 : vector<8x8xf32>
    %c0_12 = arith.constant 0 : index
    %c0_13 = arith.constant 0 : index
    %c0_14 = arith.constant 0 : index
    %c0_15 = arith.constant 0 : index
    %21 = vector.load %arg5[%c0_12, %c0_13, %c0_14, %c0_15] : memref<1x1x8x8xf32, #tpu.memory_space<vmem>>, vector<1x1x8x8xf32>
    %22 = vector.shape_cast %21 : vector<1x1x8x8xf32> to vector<8x8xf32>
    %23 = vector.shape_cast %20 : vector<8x8xf32> to vector<1x1x8x8xf32>
    tpu.vector_store %arg5[%c0_12, %c0_13, %c0_14, %c0_15], %23 {strides = array<i32>} : memref<1x1x8x8xf32, #tpu.memory_space<vmem>>, vector<1x1x8x8xf32>,
    return
  }
  func.func @transform_0(%arg0: i32, %arg1: i32, %arg2: i32) -> (i32, i32, i32, i32) {
    %c0_i32 = arith.constant 0 : i32
    %c0_i32_0 = arith.constant 0 : i32
    return %arg0, %arg1, %arg2, %c0_i32 : i32, i32, i32, i32
  }
  func.func @transform_1(%arg0: i32, %arg1: i32, %arg2: i32) -> (i32, i32, i32, i32) {
    %c0_i32 = arith.constant 0 : i32
    %c0_i32_0 = arith.constant 0 : i32
    return %arg0, %arg1, %arg2, %c0_i32 : i32, i32, i32, i32
  }
  func.func @transform_2(%arg0: i32, %arg1: i32, %arg2: i32) -> (i32, i32, i32, i32) {
    %c0_i32 = arith.constant 0 : i32
    %c0_i32_0 = arith.constant 0 : i32
    return %arg0, %arg1, %arg2, %c0_i32 : i32, i32, i32, i32
  }
}

</mosaic_0001>

<bundles_post_ra>
// kernel: tpu_custom_call.1
= control target key start
LH: loop header
LB: loop body
LE: loop exit
PB: predicated region body
PF: predicated region fallthrough
CT: control target
= control target key end

     0   :  { %7 = vsyncpa [#allocation3], 0  ;;  %s699_s0 = inlined_call_operand.vmem [shape: f32[2,4,8,1], index: 0, kind: input, shape index: {}]   ;;  %s700_s1 = inlined_call_operand.vmem [shape: f32[2,4,8,8], index: 1, kind: input, shape index: {}]   ;;  %s701_s2 = inlined_call_operand.hbm [shape: f32[2,4,8,8], index: 2, kind: output, shape index: {}]  }
   0x1   :  { %9 = vsyncpa [#allocation3 + $0x1], 0  ;;  %s572_s9 = smov 0   ;;  %s574_s10 = smov 0  }
   0x2   :  { %s576_s11 = smov 0   ;;  %s578_s12 = smov 0  }
   0x3   :  { %s580_s13 = smov 0   ;;  %s582_s14 = smov 0  }
   0x4   :  { %s584_s15 = smov 0   ;;  %s586_s16 = smov 0  }
   0x5 LB: > { %s372_s17 = sadd.s32 4294967295, %s553_s16   ;;  %s373_s18 = sadd.s32 4294967294, %s553_s16   ;;  %s553_s16 = sphi %s586_s16, %s15_s16   ;;  %s549_s15 = sphi %s584_s15, %s710_s15   ;;  %s545_s14 = sphi %s582_s14, %s709_s14   ;;  %s541_s13 = sphi %s580_s13, %s708_s13   ;;  %s537_s12 = sphi %s578_s12, %s707_s12   ;;  %s533_s11 = sphi %s576_s11, %s706_s11   ;;  %s529_s10 = sphi %s574_s10, %s705_s10   ;;  %s525_s9 = sphi %s572_s9, %s704_s9  }
   0x6   : > { %s30_s19 = sadd.s32 1, %s545_s14  ;;  %s34_s20 = sadd.s32 1, %s549_s15 }
   0x7   : > { %p32_p0 = scmp.ge.s32.totalorder %s30_s19, 4  ;;  %p115_p1 = scmp.ne.s32.totalorder %s533_s11, %s529_s10 }
   0x8   : > { %p116_p2 = scmp.eq.s32.totalorder %s372_s17, 7  ;;  %p121_p5 = scmp.ne.s32.totalorder %s529_s10, %s525_s9 }
   0x9   : > { %s712_s19 = smov (%p32_p0, %s30_s19), 0  ;;  %s714_s20 = smov (!%p32_p0, %s34_s20), %s549_s15 }
   0xa   : > { %s99_s21 = ssub.s32 %s545_s14, %s712_s19  ;;  %p623_p3 = por %p116_p2, %p115_p1 }
   0xb   : > { %p36_p4 = scmp.ge.s32.totalorder %s714_s20, 2  ;;  %p122_p6 = scmp.eq.s32.totalorder %s373_s18, 7 }
   0xc   : > { %p376_p7 = scmp.ge.s32.totalorder %s553_s16, 1  ;;  %p168_p9 = scmp.lt.s32.totalorder %s553_s16, 9 }
   0xd   : > { %s716_s20 = smov (%p36_p4, %s714_s20), 0  ;;  %p632_p8 = por %p122_p6, %p121_p5 }
   0xe   : > { %s98_s24 = ssub.s32 %s549_s15, %s716_s20  ;;  %s105_s25 = sadd.s32 1, %s533_s11 }
   0xf   : > { %s100_s26 = sor.u32 %s99_s21, %s98_s24  ;;  %p169_p10 = pnand %p376_p7, %p168_p9 }
  0x10   : > { %p103_p11 = scmp.eq.s32.totalorder %s100_s26, 0  ;;  %p207_p12 = scmp.lt.s32.totalorder (!%p169_p10), %s541_s13, 1 }
  0x11   : > { %172 = sbr.rel (%p169_p10) target bundleno = 180 (0xb4), region = 28  ;;  %p209_p13 = scmp.lt.s32.totalorder (!%p169_p10), %s537_s12, 3 }
  0x12   : > { %s641_s27 = scalar_select %p103_p11, %s533_s11, %s105_s25  }
  0x13   : > { %s204_s8 = sand.u32 (!%p169_p10), 1, %s529_s10   ;;  %s384_s18 = sshll.u32 (!%p169_p10), %s541_s13, 2 }
  0x14   : > { %s377_s17 = sshll.u32 (!%p169_p10), %s204_s8, 3  ;;  %s262_s26 = sadd.s32 (!%p169_p10), %s537_s12, %s384_s18 }
  0x15   : > { %s250_s6 = scalar_lea.sflag (!%p169_p10), [#allocation3], %s204_s8 }
  0x16   : > { %v555_v0 = vmov 0   ;;  %s208_s28 = scalar_select %p207_p12, %s541_s13, 1  ;;  %v231_v3 = vlaneseq  ;;  %vm247_vm0 = vcmask 64512  }
  0x17   : > { %460 = vset.pattern.permute.xlu0 %v555_v0  ;;  %s210_s29 = scalar_select %p209_p13, %s537_s12, 3 }
  0x18   : > { %s378_s30 = sshll.u32 %s208_s28, 2  ;;  %v232_v4 = vand.u32 127, %v231_v3  ;;  %s385_s28 = sshll.u32 %s262_s26, 7 }
  0x19   : > { %s215_s3 = sadd.s32 %s378_s30, %s210_s29  ;;  %s206_s29 = scalar_lea.vmem [#allocation2], %s377_s17 }
  0x1a   : > { %s379_s4 = sshll.u32 %s215_s3, 3  ;;  %v233_v5 = vcvt.s32.f32 %v232_v4  ;;  %s266_s30 = sshll.u32 %s206_s29, 4  ;;  %s267_s30 = int_to_ptr.vmem [resolvable:$true] %s266_s30 }
  0x1b   : > { %s217_s7 = scalar_lea.vmem %s699_s0, %s379_s4  ;;  %s228_s25 = scalar_lea.vmem %s700_s1, %s379_s4 }
  0x1c   : > { %v230_v1 = vld [vmem:[%s217_s7] sm:$0xff]  ;;  %v382_v6 = vadd.f32 -7.0, %v233_v5  ;;  %s264_s13 = scalar_lea.hbm %s701_s2, %s385_s28  ;;  %s461_s7 = scalar_lea.vmem %s267_s30, 128 }
  0x1d   : > { %v235_v2 = vmul.f32 8.0, %v230_v1  ;;  %v229_v12 = vld [vmem:[%s228_s25] sm:$0xff]  ;;  %p462_p0 = scmp.ne.s32.totalorder %s267_s30, %s461_s7  ;;  %s556_s12 = smov [#allocation2]  }
  0x1e   : > { %s465_s4 = sshll.u32 %s556_s12, 4  ;;  %s466_s4 = int_to_ptr.vmem [resolvable:$false] %s465_s4 }
  0x1f   : > { %238 = vperm.xlu0 %460, %v235_v2   ;;  %p463_p1 = pnand %p462_p0, %p623_p3  ;;  %s467_s17 = scalar_lea.vmem %s466_s4, 256 }
  0x20   : > { %p468_p4 = scmp.lt.s32.totalorder %s267_s30, %s466_s4  ;;  %p469_p5 = scmp.lt.s32.totalorder %s467_s17, %s461_s7 }
  0x21   : > { %p464_p2 = pneg %p463_p1 }
  0x22   : > { %p470_p6 = por %p469_p5, %p468_p4 }
  0x24   : > { %p471_p7 = pnand %p470_p6, %p464_p2 }
  0x9a   : > { %v239_v7 = vpop.permute.xlu0 %238 }
  0x9b   : > { %v241_v8 = vadd.f32 %v382_v6, %v239_v7 }
  0x9d   : > { %v242_v9 = vmul.f32 0.5, %v241_v8 }
  0x9f   : > { %v243_v10 = vadd.f32 1.0, %v242_v9 }
  0xa1   : > { %v244_v11 = vmax.f32 %v243_v10, 0.0 }
  0xa3   : > { %v245_v13 = vmin.f32 %v244_v11, 1.0 }
  0xa5   : > { %v246_v14 = vmul.f32 %v245_v13, %v229_v12 }
  0xa7   : > { %248 = vst.msk [vmem:[%s206_s29] sm:$0xff] %vm247_vm0, %v246_v14 }
  0xa8   : > { %474 = shalt.err (!%p471_p7)
}
  0xa9   : > { %s475_s18 = scalar_lea.hbm %s264_s13, 128  ;;  %s479_s24 = scalar_lea.hbm %s701_s2, 1024 }
  0xaa   : > { %p476_p9 = scmp.ne.s32.totalorder %s264_s13, %s475_s18  ;;  %p480_p12 = scmp.lt.s32.totalorder %s264_s13, %s701_s2 }
  0xab   : > { %p481_p13 = scmp.lt.s32.totalorder %s479_s24, %s475_s18 }
  0xac   : > { %p477_p10 = pnand %p476_p9, %p623_p3 }
  0xad   : > { %p482_p0 = por %p481_p13, %p480_p12 }
  0xae   : > { %p478_p11 = pneg %p477_p10 }
  0xb0   : > { %p483_p1 = pnand %p482_p0, %p478_p11 }
  0xb2   : > { %486 = shalt.err (!%p483_p1)
}
  0xb3   : > { %388 = dma.vmem_to_hbm [thread:$0]  (%p623_p3), %s267_s30, 128, %s264_s13, %s250_s6  }
  0xb4 PF: > { %p394_p2 = scmp.ge.s32.totalorder %s553_s16, 2  ;;  %s278_s28 = sand.u32 1, %s525_s9  }
  0xb5   : > { %s279_s29 = scalar_lea.sflag [#allocation3], %s278_s28 }
  0xb6   : > { %p391_p4 = pnand %p394_p2, %p632_p8 }
  0xb8   : > { %p392_p5 = pneg %p391_p4 }
  0xba   : > { %520 = dma.done.wait (%p392_p5), %s279_s29, 128  }
  0xbb   : > { %522 = vsyncadd (%p392_p5), %s279_s29, 4294967168  ;;  %s15_s16 = sadd.s32 1, %s553_s16   ;;  %s704_s9 = smov %s529_s10 }
  0xbc   : > { %p12_p6 = scmp.ge.s32.totalorder %s15_s16, 10   ;;  %s705_s10 = smov %s533_s11 }
  0xbd   : > { %s706_s11 = smov %s641_s27  ;;  %s707_s12 = smov %s545_s14 }
  0xbe   : > { %s708_s13 = smov %s549_s15  ;;  %s709_s14 = smov %s712_s19 }
  0xbf   : > { %s710_s15 = smov %s716_s20  ;;  %14 = sbr.rel (!%p12_p6) target bundleno = 5 (0x5), region = 66 }
  0xc4   :  { %284 = vsyncpa [#allocation3], 1 }
  0xc5   :  { %286 = vsyncpa [#allocation3 + $0x1], 1 }

</bundles_post_ra>
